<compile_context>
chip_gen: v6e
topology: v6e:2x2x1
jax: 0.10.0
libtpu: 0.0.40
codegen_flags: <defaults>
</compile_context>

<pallas_src>
import functools

import jax
import jax.numpy as jnp
from jax.experimental import pallas as pl
from jax.experimental.pallas import tpu as pltpu

_EPS = 1e-5
_BLOCK_BYTES_BUDGET = 4 * 1024 * 1024    # per x-block (double-buffered in+out = 16 MiB)
_LANE = 128


def _vmem_limit_bytes():
    """Generation-aware scoped-VMEM limit (half of physical, capped at 64 MiB)."""
    try:
        cap = pltpu.get_tpu_info().vmem_capacity_bytes
    except Exception:
        cap = 64 * 1024 * 1024           # conservative (v7x physical VMEM)
    return min(cap // 2, 64 * 1024 * 1024)


def _row_tiling(r, c, itemsize):
    """Pick row tile tr (multiple of 8 or full extent) and padded row count.

    Guarantees c * tr * 128 * itemsize <= _BLOCK_BYTES_BUDGET (modulo the
    minimum 8-sublane tile) and tr | r_pad, so blocks always divide evenly.
    """
    bytes_per_row = c * _LANE * itemsize
    max_rows = max(8, _BLOCK_BYTES_BUDGET // bytes_per_row)
    if r <= max_rows:
        return r, r                                  # full extent -> always legal
    tr = (max_rows // 8) * 8                         # >= 8
    r_pad = ((r + tr - 1) // tr) * tr
    return tr, r_pad


# ---------------------------------------------------------------------------
# Kernels
# ---------------------------------------------------------------------------
def _fused_kernel(x_ref, g_ref, b_ref, o_ref, *, inv_m):
    """Single-pass: stats + normalize + residual on a VMEM-resident x."""
    x = x_ref[...].astype(jnp.float32)                       # (N, C, R, L)
    xx = x * x
    # stepwise reductions (sublane -> major -> lane) keep Mosaic lowering simple
    s = jnp.sum(x, axis=2, keepdims=True)                    # (N, C, 1, L)
    s = jnp.sum(s, axis=0, keepdims=True)                    # (1, C, 1, L)
    s = jnp.sum(s, axis=3, keepdims=True)                    # (1, C, 1, 1)
    sq = jnp.sum(xx, axis=2, keepdims=True)
    sq = jnp.sum(sq, axis=0, keepdims=True)
    sq = jnp.sum(sq, axis=3, keepdims=True)                  # (1, C, 1, 1)
    mean = s * inv_m
    var = jnp.maximum(sq * inv_m - mean * mean, 0.0)         # biased variance
    sc = g_ref[...] * jax.lax.rsqrt(var + _EPS)              # (1, C, 1, L)
    # residual folded in:  out = x * (1 + sc) + (beta - mean * sc)
    y = x * (1.0 + sc) + (b_ref[...] - mean * sc)
    o_ref[...] = y.astype(o_ref.dtype)


def _partial_stats_kernel(x_ref, psum_ref, psq_ref):
    """Per-batch partial sum / sumsq, accumulated in the VMEM-resident output."""
    @pl.when(pl.program_id(1) == 0)
    def _init():
        psum_ref[...] = jnp.zeros_like(psum_ref)
        psq_ref[...] = jnp.zeros_like(psq_ref)

    x = x_ref[...].astype(jnp.float32)                       # (C, tr, L)
    psum_ref[...] += jnp.sum(x, axis=1, keepdims=True)       # (C, 1, L)
    psq_ref[...] += jnp.sum(x * x, axis=1, keepdims=True)    # (C, 1, L)


def _apply_kernel(x_ref, scale_ref, bias_ref, o_ref):
    """out = x * scale + bias   (normalize + residual as one FMA/element)."""
    x = x_ref[...].astype(jnp.float32)                       # (C, tr, L)
    y = x * scale_ref[...] + bias_ref[...]                   # (C,1,L) broadcasts
    o_ref[...] = y.astype(o_ref.dtype)


# ---------------------------------------------------------------------------
# Wrapper
# ---------------------------------------------------------------------------
@functools.partial(jax.jit, static_argnames=("force_two_pass",))
def residual_forward(x_ncdhw, gamma, beta, *, force_two_pass=False):
    """out = BatchNorm3d(x) + x  (training-mode batch statistics)."""
    N, C, D, H, W = x_ncdhw.shape
    S = D * H * W
    L = _LANE
    R = -(-S // L)                                           # ceil
    itemsize = jnp.dtype(x_ncdhw.dtype).itemsize
    tr, R_pad = _row_tiling(R, C, itemsize)
    S_pad = R_pad * L

    x_flat = x_ncdhw.reshape(N, C, S)
    if S_pad != S:
        # zero padding keeps sum/sumsq exact (inv_m uses the true count);
        # padded lanes are sliced off the output below.
        x_flat = jnp.pad(x_flat, ((0, 0), (0, 0), (0, S_pad - S)))
    x4 = x_flat.reshape(N, C, R_pad, L)                      # lane-dense layout

    inv_m = 1.0 / float(N * S)                               # TRUE element count
    vmem_limit = _vmem_limit_bytes()
    g = gamma.astype(jnp.float32)
    b = beta.astype(jnp.float32)

    # ---- fast path: whole x fits in VMEM -> one read + one write ----------
    fused_ok = (not force_two_pass) and (x4.size * 4 * 5 <= vmem_limit)
    if fused_ok:
        g4 = jnp.broadcast_to(g.reshape(1, C, 1, 1), (1, C, 1, L))
        b4 = jnp.broadcast_to(b.reshape(1, C, 1, 1), (1, C, 1, L))
        full_x = pl.BlockSpec((N, C, R_pad, L), lambda i: (0, 0, 0, 0))
        full_cb = pl.BlockSpec((1, C, 1, L), lambda i: (0, 0, 0, 0))
        out4 = pl.pallas_call(
            functools.partial(_fused_kernel, inv_m=inv_m),
            out_shape=jax.ShapeDtypeStruct(x4.shape, x4.dtype),
            grid=(1,),
            in_specs=[full_x, full_cb, full_cb],
            out_specs=full_x,
            compiler_params=pltpu.CompilerParams(
                dimension_semantics=("arbitrary",),
                vmem_limit_bytes=vmem_limit),
        )(x4, g4, b4)
    else:
        grid = (N, R_pad // tr)
        x_spec = pl.BlockSpec((None, C, tr, L), lambda n, t: (n, 0, t, 0))
        cb_spec = pl.BlockSpec((None, C, 1, L), lambda n, t: (0, 0, 0, 0))
        stat_spec = pl.BlockSpec((None, C, 1, L), lambda n, t: (n, 0, 0, 0))

        # ---- pass 1: per-batch partial stats (N axis parallel -> megacore) --
        psum, psq = pl.pallas_call(
            _partial_stats_kernel,
            out_shape=(jax.ShapeDtypeStruct((N, C, 1, L), jnp.float32),
                       jax.ShapeDtypeStruct((N, C, 1, L), jnp.float32)),
            grid=grid,
            in_specs=[x_spec],
            out_specs=(stat_spec, stat_spec),
            compiler_params=pltpu.CompilerParams(
                dimension_semantics=("parallel", "arbitrary"),
                vmem_limit_bytes=vmem_limit),
        )(x4)

        # ---- tiny combine + fused scale/bias finalize in plain JAX ----------
        # TODO(synk): shifted/Welford accumulation if inputs are far from
        # zero-centered (E[x^2]-E[x]^2 cancellation).
        s = jnp.sum(psum, axis=(0, 2, 3))                    # (C,)
        sq = jnp.sum(psq, axis=(0, 2, 3))                    # (C,)
        mean = s * inv_m
        var = jnp.maximum(sq * inv_m - mean * mean, 0.0)     # biased variance
        sc = g * jax.lax.rsqrt(var + _EPS)
        scale = jnp.broadcast_to((1.0 + sc).reshape(1, C, 1, 1), (1, C, 1, L))
        bias = jnp.broadcast_to((b - mean * sc).reshape(1, C, 1, 1), (1, C, 1, L))

        # ---- pass 2: normalize + residual (both axes parallel) --------------
        out4 = pl.pallas_call(
            _apply_kernel,
            out_shape=jax.ShapeDtypeStruct(x4.shape, x4.dtype),
            grid=grid,
            in_specs=[x_spec, cb_spec, cb_spec],
            out_specs=x_spec,
            compiler_params=pltpu.CompilerParams(
                dimension_semantics=("parallel", "parallel"),
                vmem_limit_bytes=vmem_limit),
        )(x4, scale, bias)

    out = out4.reshape(N, C, S_pad)
    if S_pad != S:
        out = out[:, :, :S]
    return out.reshape(N, C, D, H, W)


def _reference(x_ncdhw, gamma, beta):
    """Pure-JAX reference of training-mode BatchNorm3d(x) + x."""
    x = x_ncdhw.astype(jnp.float32)
    mean = jnp.mean(x, axis=(0, 2, 3, 4), keepdims=True)
    var = jnp.mean((x - mean) ** 2, axis=(0, 2, 3, 4), keepdims=True)
    g = gamma.reshape(1, -1, 1, 1, 1)
    b = beta.reshape(1, -1, 1, 1, 1)
    y = (x - mean) * jax.lax.rsqrt(var + _EPS) * g + b
    return y + x


if __name__ == "__main__":
    # Module config: dim (=channels); patch_size only parameterizes the Conv3d,
    # whose output is dead code in the reference forward, so no conv weights.
    dim = 4
    patch_size = 9  # Conv3d(dim, dim, kernel_size=patch_size, groups=dim, padding=4) -- dead code

    key = jax.random.PRNGKey(0)
    kx, kg, kb, kx2 = jax.random.split(key, 4)

    N, D, H, W = 2, 8, 8, 8
    x = jax.random.normal(kx, (N, dim, D, H, W), dtype=jnp.float32)
    gamma = 1.0 + 0.1 * jax.random.normal(kg, (dim,), dtype=jnp.float32)
    beta = 0.1 * jax.random.normal(kb, (dim,), dtype=jnp.float32)
    ref = _reference(x, gamma, beta)

    # 1) single-pass VMEM-resident fast path (default for small inputs)
    out = jax.block_until_ready(residual_forward(x, gamma, beta))
    assert out.shape == x.shape
    assert jnp.allclose(out, ref, atol=1e-4, rtol=1e-4), "fused path mismatch"

    # 2) two-pass tiled path (stats + apply), forced for coverage
    out2 = jax.block_until_ready(residual_forward(x, gamma, beta, force_two_pass=True))
    assert jnp.allclose(out2, ref, atol=1e-4, rtol=1e-4), "two-pass mismatch"

    # 3) lane-padding path (S = 125 not divisible by 128)
    x_odd = jax.random.normal(kx2, (N, dim, 5, 5, 5), dtype=jnp.float32)
    ref_odd = _reference(x_odd, gamma, beta)
    out3 = jax.block_until_ready(residual_forward(x_odd, gamma, beta, force_two_pass=True))
    assert jnp.allclose(out3, ref_odd, atol=1e-4, rtol=1e-4), "padded path mismatch"

    print("KERNEL_OK")
</pallas_src>

<mosaic_0001>
module attributes {stable_mosaic.version = 11 : i64} {
  func.func @_fused_kernel(%arg0: i32, %arg1: memref<2x4x4x128xf32, #tpu.memory_space<vmem>>, %arg2: memref<1x4x1x128xf32, #tpu.memory_space<vmem>>, %arg3: memref<1x4x1x128xf32, #tpu.memory_space<vmem>>, %arg4: memref<2x4x4x128xf32, #tpu.memory_space<vmem>>) attributes {dimension_semantics = [#tpu.dimension_semantics<arbitrary>], iteration_bounds = array<i64: 1>, scalar_prefetch = 0 : i64, scratch_operands = 0 : i64, tpu.core_type = #tpu.core_type<tc>, window_params = [{pipeline_mode = #tpu.pipeline_mode<synchronous>, transform_indices = @transform_0, window_bounds = array<i64: 2, 4, 4, 128>}, {pipeline_mode = #tpu.pipeline_mode<synchronous>, transform_indices = @transform_1, window_bounds = array<i64: 1, 4, 1, 128>}, {pipeline_mode = #tpu.pipeline_mode<synchronous>, transform_indices = @transform_2, window_bounds = array<i64: 1, 4, 1, 128>}, {pipeline_mode = #tpu.pipeline_mode<synchronous>, transform_indices = @transform_3, window_bounds = array<i64: 2, 4, 4, 128>}]} {
    %c0 = arith.constant 0 : index
    %c0_0 = arith.constant 0 : index
    %c0_1 = arith.constant 0 : index
    %c0_2 = arith.constant 0 : index
    %0 = vector.load %arg1[%c0, %c0_0, %c0_1, %c0_2] : memref<2x4x4x128xf32, #tpu.memory_space<vmem>>, vector<2x4x4x128xf32>
    %1 = arith.mulf %0, %0 : vector<2x4x4x128xf32>
    %cst = arith.constant dense<0.000000e+00> : vector<2x4x128xf32>
    %2 = vector.multi_reduction <add>, %0, %cst [2] : vector<2x4x4x128xf32> to vector<2x4x128xf32>
    %3 = vector.shape_cast %2 : vector<2x4x128xf32> to vector<2x4x1x128xf32>
    %cst_3 = arith.constant dense<0.000000e+00> : vector<4x1x128xf32>
    %4 = vector.multi_reduction <add>, %3, %cst_3 [0] : vector<2x4x1x128xf32> to vector<4x1x128xf32>
    %5 = vector.shape_cast %4 : vector<4x1x128xf32> to vector<1x4x1x128xf32>
    %cst_4 = arith.constant dense<0.000000e+00> : vector<1x4x1xf32>
    %6 = vector.multi_reduction <add>, %5, %cst_4 [3] : vector<1x4x1x128xf32> to vector<1x4x1xf32>
    %7 = vector.shape_cast %6 : vector<1x4x1xf32> to vector<1x4x1x1xf32>
    %cst_5 = arith.constant dense<0.000000e+00> : vector<2x4x128xf32>
    %8 = vector.multi_reduction <add>, %1, %cst_5 [2] : vector<2x4x4x128xf32> to vector<2x4x128xf32>
    %9 = vector.shape_cast %8 : vector<2x4x128xf32> to vector<2x4x1x128xf32>
    %cst_6 = arith.constant dense<0.000000e+00> : vector<4x1x128xf32>
    %10 = vector.multi_reduction <add>, %9, %cst_6 [0] : vector<2x4x1x128xf32> to vector<4x1x128xf32>
    %11 = vector.shape_cast %10 : vector<4x1x128xf32> to vector<1x4x1x128xf32>
    %cst_7 = arith.constant dense<0.000000e+00> : vector<1x4x1xf32>
    %12 = vector.multi_reduction <add>, %11, %cst_7 [3] : vector<1x4x1x128xf32> to vector<1x4x1xf32>
    %13 = vector.shape_cast %12 : vector<1x4x1xf32> to vector<1x4x1x1xf32>
    %cst_8 = arith.constant 9.765625E-4 : f32
    %14 = vector.broadcast %cst_8 : f32 to vector<1x4x1x1xf32>
    %15 = arith.mulf %7, %14 : vector<1x4x1x1xf32>
    %cst_9 = arith.constant 9.765625E-4 : f32
    %16 = vector.broadcast %cst_9 : f32 to vector<1x4x1x1xf32>
    %17 = arith.mulf %13, %16 : vector<1x4x1x1xf32>
    %18 = arith.mulf %15, %15 : vector<1x4x1x1xf32>
    %19 = arith.subf %17, %18 : vector<1x4x1x1xf32>
    %cst_10 = arith.constant 0.000000e+00 : f32
    %20 = vector.broadcast %cst_10 : f32 to vector<1x4x1x1xf32>
    %21 = arith.maximumf %19, %20 : vector<1x4x1x1xf32>
    %c0_11 = arith.constant 0 : index
    %c0_12 = arith.constant 0 : index
    %c0_13 = arith.constant 0 : index
    %c0_14 = arith.constant 0 : index
    %22 = vector.load %arg2[%c0_11, %c0_12, %c0_13, %c0_14] : memref<1x4x1x128xf32, #tpu.memory_space<vmem>>, vector<1x4x1x128xf32>
    %cst_15 = arith.constant 9.99999974E-6 : f32
    %23 = vector.broadcast %cst_15 : f32 to vector<1x4x1x1xf32>
    %24 = arith.addf %21, %23 : vector<1x4x1x1xf32>
    %25 = math.rsqrt %24 : vector<1x4x1x1xf32>
    %26 = vector.broadcast %25 : vector<1x4x1x1xf32> to vector<1x4x1x128xf32>
    %27 = arith.mulf %22, %26 : vector<1x4x1x128xf32>
    %cst_16 = arith.constant 1.000000e+00 : f32
    %28 = vector.broadcast %cst_16 : f32 to vector<1x4x1x128xf32>
    %29 = arith.addf %28, %27 : vector<1x4x1x128xf32>
    %30 = vector.broadcast %29 : vector<1x4x1x128xf32> to vector<2x4x4x128xf32>
    %31 = arith.mulf %0, %30 : vector<2x4x4x128xf32>
    %c0_17 = arith.constant 0 : index
    %c0_18 = arith.constant 0 : index
    %c0_19 = arith.constant 0 : index
    %c0_20 = arith.constant 0 : index
    %32 = vector.load %arg3[%c0_17, %c0_18, %c0_19, %c0_20] : memref<1x4x1x128xf32, #tpu.memory_space<vmem>>, vector<1x4x1x128xf32>
    %33 = vector.broadcast %15 : vector<1x4x1x1xf32> to vector<1x4x1x128xf32>
    %34 = arith.mulf %33, %27 : vector<1x4x1x128xf32>
    %35 = arith.subf %32, %34 : vector<1x4x1x128xf32>
    %36 = vector.broadcast %35 : vector<1x4x1x128xf32> to vector<2x4x4x128xf32>
    %37 = arith.addf %31, %36 : vector<2x4x4x128xf32>
    %c0_21 = arith.constant 0 : index
    %c0_22 = arith.constant 0 : index
    %c0_23 = arith.constant 0 : index
    %c0_24 = arith.constant 0 : index
    %38 = vector.load %arg4[%c0_21, %c0_22, %c0_23, %c0_24] : memref<2x4x4x128xf32, #tpu.memory_space<vmem>>, vector<2x4x4x128xf32>
    tpu.vector_store %arg4[%c0_21, %c0_22, %c0_23, %c0_24], %37 {strides = array<i32>} : memref<2x4x4x128xf32, #tpu.memory_space<vmem>>, vector<2x4x4x128xf32>,
    return
  }
  func.func @transform_0(%arg0: i32) -> (i32, i32, i32, i32) {
    %c0_i32 = arith.constant 0 : i32
    %c0_i32_0 = arith.constant 0 : i32
    %c0_i32_1 = arith.constant 0 : i32
    %c0_i32_2 = arith.constant 0 : i32
    %c0_i32_3 = arith.constant 0 : i32
    return %c0_i32, %c0_i32_0, %c0_i32_1, %c0_i32_2 : i32, i32, i32, i32
  }
  func.func @transform_1(%arg0: i32) -> (i32, i32, i32, i32) {
    %c0_i32 = arith.constant 0 : i32
    %c0_i32_0 = arith.constant 0 : i32
    %c0_i32_1 = arith.constant 0 : i32
    %c0_i32_2 = arith.constant 0 : i32
    %c0_i32_3 = arith.constant 0 : i32
    return %c0_i32, %c0_i32_0, %c0_i32_1, %c0_i32_2 : i32, i32, i32, i32
  }
  func.func @transform_2(%arg0: i32) -> (i32, i32, i32, i32) {
    %c0_i32 = arith.constant 0 : i32
    %c0_i32_0 = arith.constant 0 : i32
    %c0_i32_1 = arith.constant 0 : i32
    %c0_i32_2 = arith.constant 0 : i32
    %c0_i32_3 = arith.constant 0 : i32
    return %c0_i32, %c0_i32_0, %c0_i32_1, %c0_i32_2 : i32, i32, i32, i32
  }
  func.func @transform_3(%arg0: i32) -> (i32, i32, i32, i32) {
    %c0_i32 = arith.constant 0 : i32
    %c0_i32_0 = arith.constant 0 : i32
    %c0_i32_1 = arith.constant 0 : i32
    %c0_i32_2 = arith.constant 0 : i32
    %c0_i32_3 = arith.constant 0 : i32
    return %c0_i32, %c0_i32_0, %c0_i32_1, %c0_i32_2 : i32, i32, i32, i32
  }
}

</mosaic_0001>

<bundles_post_ra>
// kernel: residual_forward.1
= control target key start
LH: loop header
LB: loop body
LE: loop exit
PB: predicated region body
PF: predicated region fallthrough
CT: control target
= control target key end

     0   :  { %vm30_vm0 = vcmask 1043456   ;;  %s470_s0 = inlined_call_operand.vmem [shape: f32[2,4,4,128], index: 0, kind: input, shape index: {}]   ;;  %s471_s1 = inlined_call_operand.vmem [shape: f32[1,4,1,128], index: 1, kind: input, shape index: {}]   ;;  %s472_s2 = inlined_call_operand.vmem [shape: f32[1,4,1,128], index: 2, kind: input, shape index: {}]   ;;  %s473_s3 = inlined_call_operand.vmem [shape: f32[2,4,4,128], index: 3, kind: output, shape index: {}]  }
   0x1   :  { %v326_v0 = vld [vmem:[%s470_s0 + $0x8] sm:$0xf]  ;;  %v331_v1 = vld [vmem:[%s470_s0 + $0x18] sm:$0xf]  ;;  %v336_v2 = vld [vmem:[%s470_s0] sm:$0xf] }
   0x2   :  { %v45_v3 = vsel %vm30_vm0, %v326_v0, 0.0  ;;  %v73_v4 = vsel %vm30_vm0, %v331_v1, 0.0  ;;  %v345_v5 = vld [vmem:[%s470_s0 + $0x10] sm:$0xf]  ;;  %v31_v6 = vsel %vm30_vm0, %v336_v2, 0.0  ;;  %v351_v7 = vmul.f32 %v336_v2, %v336_v2 }
   0x3   :  { %v46_v8 = vrot.slane %v45_v3, 4  ;;  %v74_v9 = vrot.slane %v73_v4, 4  ;;  %v32_v10 = vrot.slane %v31_v6, 4  ;;  %v59_v11 = vsel %vm30_vm0, %v345_v5, 0.0  ;;  %v358_v12 = vld [vmem:[%s470_s0 + $0xc] sm:$0xf] }
   0x4   :  { %v60_v13 = vrot.slane %v59_v11, 4  ;;  %v363_v14 = vld [vmem:[%s470_s0 + $0x1c] sm:$0xf]  ;;  %v52_v15 = vsel %vm30_vm0, %v358_v12, 0.0  ;;  %v370_v16 = vld [vmem:[%s470_s0 + $0x4] sm:$0xf]  ;;  %v26_v17 = vmul.f32 %v345_v5, %v345_v5  ;;  %v376_v18 = vmul.f32 %v358_v12, %v358_v12 }
   0x5   :  { %v47_v19 = vadd.f32 %v46_v8, %v45_v3  ;;  %v75_v20 = vadd.f32 %v74_v9, %v73_v4  ;;  %v33_v21 = vadd.f32 %v32_v10, %v31_v6  ;;  %v53_v22 = vrot.slane %v52_v15, 4  ;;  %v381_v23 = vld [vmem:[%s470_s0 + $0x14] sm:$0xf] }
   0x6   :  { %v61_v24 = vadd.f32 %v60_v13, %v59_v11  ;;  %v80_v25 = vsel %vm30_vm0, %v363_v14, 0.0  ;;  %v38_v26 = vsel %vm30_vm0, %v370_v16, 0.0  ;;  %v66_v27 = vsel %vm30_vm0, %v381_v23, 0.0 }
   0x7   :  { %v48_v28 = vrot.slane %v47_v19, 2  ;;  %v76_v29 = vrot.slane %v75_v20, 2  ;;  %v34_v30 = vrot.slane %v33_v21, 2  ;;  %v54_v31 = vadd.f32 %v53_v22, %v52_v15 }
   0x8   :  { %v62_v32 = vrot.slane %v61_v24, 2  ;;  %v81_v33 = vrot.slane %v80_v25, 4  ;;  %v39_v34 = vrot.slane %v38_v26, 4  ;;  %v67_v35 = vrot.slane %v66_v27, 4 }
   0x9   :  { %v49_v36 = vadd.f32 %v48_v28, %v47_v19  ;;  %v77_v37 = vadd.f32 %v76_v29, %v75_v20  ;;  %v35_v38 = vadd.f32 %v34_v30, %v33_v21  ;;  %v55_v39 = vrot.slane %v54_v31, 2 }
   0xa   :  { %v63_v40 = vadd.f32 %v62_v32, %v61_v24  ;;  %v82_v41 = vadd.f32 %v81_v33, %v80_v25  ;;  %v40_v42 = vadd.f32 %v39_v34, %v38_v26  ;;  %v68_v43 = vadd.f32 %v67_v35, %v66_v27 }
   0xb   :  { %v50_v44 = vrot.slane %v49_v36, 1  ;;  %v78_v45 = vrot.slane %v77_v37, 1  ;;  %v36_v46 = vrot.slane %v35_v38, 1  ;;  %v56_v47 = vadd.f32 %v55_v39, %v54_v31 }
   0xc   :  { %v64_v48 = vrot.slane %v63_v40, 1  ;;  %v83_v49 = vrot.slane %v82_v41, 2  ;;  %v41_v50 = vrot.slane %v40_v42, 2  ;;  %v69_v51 = vrot.slane %v68_v43, 2 }
   0xd   :  { %v51_v52 = vadd.f32 %v50_v44, %v49_v36  ;;  %v79_v53 = vadd.f32 %v78_v45, %v77_v37  ;;  %v37_v54 = vadd.f32 %v36_v46, %v35_v38  ;;  %v57_v55 = vrot.slane %v56_v47, 1 }
   0xe   :  { %v65_v56 = vadd.f32 %v64_v48, %v63_v40  ;;  %v84_v57 = vadd.f32 %v83_v49, %v82_v41  ;;  %v42_v58 = vadd.f32 %v41_v50, %v40_v42  ;;  %v70_v59 = vadd.f32 %v69_v51, %v68_v43 }
   0xf   :  { %v89_v60 = vadd.f32 %v79_v53, %v51_v52  ;;  %v58_v61 = vadd.f32 %v57_v55, %v56_v47  ;;  %v23_v62 = vmul.f32 %v370_v16, %v370_v16  ;;  %v27_v63 = vmul.f32 %v381_v23, %v381_v23 }
  0x10   :  { %v87_v3 = vadd.f32 %v65_v56, %v37_v54  ;;  %v85_v4 = vrot.slane %v84_v57, 1  ;;  %v43_v6 = vrot.slane %v42_v58, 1  ;;  %v71_v8 = vrot.slane %v70_v59, 1 }
  0x11   :  { %95 = vadd.xlane.f32.xlu1 %v89_v60  ;;  %v106_v9 = vsel %vm30_vm0, %v23_v62, 0.0  ;;  %v134_v10 = vsel %vm30_vm0, %v27_v63, 0.0  ;;  %v99_v11 = vsel %vm30_vm0, %v351_v7, 0.0  ;;  %v127_v13 = vsel %vm30_vm0, %v26_v17, 0.0 }
  0x12   :  { %91 = vadd.xlane.f32.xlu0 %v87_v3  ;;  %v86_v15 = vadd.f32 %v85_v4, %v84_v57  ;;  %v44_v19 = vadd.f32 %v43_v6, %v42_v58  ;;  %v72_v20 = vadd.f32 %v71_v8, %v70_v59  ;;  %v107_v21 = vrot.slane %v106_v9, 4 }
  0x13   :  { %v135_v22 = vrot.slane %v134_v10, 4  ;;  %v100_v24 = vrot.slane %v99_v11, 4  ;;  %v128_v25 = vrot.slane %v127_v13, 4  ;;  %v29_v26 = vmul.f32 %v363_v14, %v363_v14 }
  0x14   :  { %v90_v27 = vadd.f32 %v86_v15, %v58_v61  ;;  %v88_v28 = vadd.f32 %v72_v20, %v44_v19  ;;  %v108_v29 = vadd.f32 %v107_v21, %v106_v9  ;;  %v120_v30 = vsel %vm30_vm0, %v376_v18, 0.0 }
  0x15   :  { %v136_v7 = vadd.f32 %v135_v22, %v134_v10  ;;  %v101_v31 = vadd.f32 %v100_v24, %v99_v11  ;;  %v129_v17 = vadd.f32 %v128_v25, %v127_v13  ;;  %v121_v32 = vrot.slane %v120_v30, 4 }
  0x16   :  { %97 = vadd.xlane.f32.xlu1 %v90_v27  ;;  %93 = vadd.xlane.f32.xlu0 %v88_v28  ;;  %v109_v33 = vrot.slane %v108_v29, 2  ;;  %v148_v34 = vsel %vm30_vm0, %v29_v26, 0.0  ;;  %v24_v35 = vmul.f32 %v326_v0, %v326_v0  ;;  %v28_v36 = vmul.f32 %v331_v1, %v331_v1 }
  0x17   :  { %v137_v37 = vrot.slane %v136_v7, 2  ;;  %v102_v38 = vrot.slane %v101_v31, 2  ;;  %v130_v39 = vrot.slane %v129_v17, 2  ;;  %v122_v40 = vadd.f32 %v121_v32, %v120_v30 }
  0x18   :  { %v110_v18 = vadd.f32 %v109_v33, %v108_v29  ;;  %v149_v41 = vrot.slane %v148_v34, 4  ;;  %v113_v42 = vsel %vm30_vm0, %v24_v35, 0.0  ;;  %v141_v43 = vsel %vm30_vm0, %v28_v36, 0.0 }
  0x19   :  { %v138_v44 = vadd.f32 %v137_v37, %v136_v7  ;;  %v103_v45 = vadd.f32 %v102_v38, %v101_v31  ;;  %v131_v46 = vadd.f32 %v130_v39, %v129_v17  ;;  %v123_v47 = vrot.slane %v122_v40, 2 }
  0x1a   :  { %v111_v48 = vrot.slane %v110_v18, 1  ;;  %v150_v49 = vadd.f32 %v149_v41, %v148_v34  ;;  %v114_v50 = vrot.slane %v113_v42, 4  ;;  %v142_v51 = vrot.slane %v141_v43, 4 }
  0x1b   :  { %v139_v52 = vrot.slane %v138_v44, 1  ;;  %v104_v53 = vrot.slane %v103_v45, 1  ;;  %v132_v54 = vrot.slane %v131_v46, 1  ;;  %v124_v55 = vadd.f32 %v123_v47, %v122_v40 }
  0x1c   :  { %v112_v56 = vadd.f32 %v111_v48, %v110_v18  ;;  %v151_v57 = vrot.slane %v150_v49, 2  ;;  %v115_v58 = vadd.f32 %v114_v50, %v113_v42  ;;  %v143_v59 = vadd.f32 %v142_v51, %v141_v43 }
  0x1d   :  { %v140_v60 = vadd.f32 %v139_v52, %v138_v44  ;;  %v105_v61 = vadd.f32 %v104_v53, %v103_v45  ;;  %v133_v62 = vadd.f32 %v132_v54, %v131_v46  ;;  %v125_v63 = vrot.slane %v124_v55, 1 }
  0x1e   :  { %v152_v3 = vadd.f32 %v151_v57, %v150_v49  ;;  %v116_v4 = vrot.slane %v115_v58, 2  ;;  %v144_v6 = vrot.slane %v143_v59, 2 }
  0x1f   :  { %v156_v8 = vadd.f32 %v140_v60, %v112_v56  ;;  %v155_v9 = vadd.f32 %v133_v62, %v105_v61  ;;  %v126_v10 = vadd.f32 %v125_v63, %v124_v55  ;;  %v211_v56 = vlaneseq }
  0x20   :  { %v153_v11 = vrot.slane %v152_v3, 1  ;;  %v117_v13 = vadd.f32 %v116_v4, %v115_v58  ;;  %v145_v15 = vadd.f32 %v144_v6, %v143_v59  ;;  %v188_v58 = vld [vmem:[%s471_s1 + $0x1] sm:$0x1]  ;;  %v187_v59 = vld [vmem:[%s471_s1] sm:$0x1] }
  0x21   :  { %161 = vadd.xlane.f32.xlu1 %v156_v8  ;;  %159 = vadd.xlane.f32.xlu0 %v155_v9  ;;  %v212_v57 = vshrl.u32 %v211_v56, 7  ;;  %v239_v9 = vld [vmem:[%s472_s2] sm:$0x1] }
  0x22   :  { %v154_v19 = vadd.f32 %v153_v11, %v152_v3  ;;  %v118_v20 = vrot.slane %v117_v13, 1  ;;  %v146_v21 = vrot.slane %v145_v15, 1  ;;  %v240_v3 = vld [vmem:[%s472_s2 + $0x1] sm:$0x1] }
  0x23   :  { %v213_v62 = vsub.s32 0, %v212_v57 }
  0x24   :  { %v158_v22 = vadd.f32 %v154_v19, %v126_v10  ;;  %v119_v24 = vadd.f32 %v118_v20, %v117_v13  ;;  %v147_v25 = vadd.f32 %v146_v21, %v145_v15  ;;  %v190_v10 = vld [vmem:[%s471_s1 + $0x3] sm:$0x1] }
  0x26   :  { %165 = vadd.xlane.f32.xlu1 %v158_v22  ;;  %v157_v26 = vadd.f32 %v147_v25, %v119_v24  ;;  %v189_v25 = vld [vmem:[%s471_s1 + $0x2] sm:$0x1] }
  0x28   :  { %163 = vadd.xlane.f32.xlu0 %v157_v26 }
  0x9a   :  { %v96_v27 = vpop.xlane.xlu1 %95 }
  0x9b   :  { %v92_v28 = vpop.xlane.xlu0 %91  ;;  %v409_v40 = vmul.f32 0.0009765625, %v96_v27 }
  0x9c   :  { %v167_v7 = vmul.f32 0.0009765625, %v92_v28 }
  0x9d   :  { %v177_v48 = vmul.f32 %v409_v40, %v409_v40 }
  0x9e   :  { %v175_v33 = vmul.f32 %v167_v7, %v167_v7 }
  0x9f   :  { %v98_v29 = vpop.xlane.xlu1 %97  ;;  %v94_v30 = vpop.xlane.xlu0 %93 }
  0xa0   :  { %v168_v31 = vmul.f32 0.0009765625, %v94_v30  ;;  %v170_v37 = vmul.f32 0.0009765625, %v98_v29 }
  0xa2   :  { %v176_v34 = vmul.f32 %v168_v31, %v168_v31  ;;  %v178_v43 = vmul.f32 %v170_v37, %v170_v37 }
  0xaa   :  { %v162_v17 = vpop.xlane.xlu1 %161  ;;  %v160_v32 = vpop.xlane.xlu0 %159 }
  0xab   :  { %v172_v35 = vmul.f32 0.0009765625, %v162_v17  ;;  %v171_v36 = vmul.f32 0.0009765625, %v160_v32  ;;  %v242_v17 = vld [vmem:[%s472_s2 + $0x3] sm:$0x1] }
  0xad   :  { %v180_v38 = vsub.f32 %v172_v35, %v176_v34  ;;  %v179_v39 = vsub.f32 %v171_v36, %v175_v33 }
  0xaf   :  { %v184_v18 = vmax.f32 %v180_v38, 0.0  ;;  %v183_v41 = vmax.f32 %v179_v39, 0.0  ;;  %v166_v42 = vpop.xlane.xlu1 %165 }
  0xb0   :  { %v174_v44 = vmul.f32 0.0009765625, %v166_v42 }
  0xb1   :  { %v192_v45 = vadd.f32 1e-05, %v184_v18  ;;  %v191_v46 = vadd.f32 1e-05, %v183_v41  ;;  %v164_v47 = vpop.xlane.xlu0 %163 }
  0xb2   :  { %v182_v49 = vsub.f32 %v174_v44, %v178_v43  ;;  %v173_v50 = vmul.f32 0.0009765625, %v164_v47 }
  0xb3   :  { %295 = vrsqrt.f32 %v192_v45 }
  0xb4   :  { %297 = vrsqrt.f32 %v191_v46  ;;  %v186_v51 = vmax.f32 %v182_v49, 0.0  ;;  %v181_v52 = vsub.f32 %v173_v50, %v177_v48 }
  0xb6   :  { %v194_v53 = vadd.f32 1e-05, %v186_v51  ;;  %v185_v54 = vmax.f32 %v181_v52, 0.0 }
  0xb8   :  { %299 = vrsqrt.f32 %v194_v53  ;;  %v193_v55 = vadd.f32 1e-05, %v185_v54 }
  0xba   :  { %301 = vrsqrt.f32 %v193_v55 }
  0xc0   :  { %v296_v60 = vpop.eup %295 }
  0xc1   :  { %v298_v61 = vpop.eup %297  ;;  %v200_v63 = vmul.f32 %v296_v60, %v188_v58 }
  0xc2   :  { %v199_v4 = vmul.f32 %v298_v61, %v187_v59 }
  0xc3   :  { %v204_v6 = vadd.f32 1.0, %v200_v63  ;;  %v244_v8 = vmul.f32 %v200_v63, %v168_v31 }
  0xc4   :  { %v203_v11 = vadd.f32 1.0, %v199_v4  ;;  %v243_v13 = vmul.f32 %v199_v4, %v167_v7 }
  0xc5   :  { %v300_v15 = vpop.eup %299  ;;  %v218_v19 = vrot.slane %v204_v6, %v213_v62  ;;  %v248_v20 = vsub.f32 %v240_v3, %v244_v8 }
  0xc6   :  { %v214_v21 = vrot.slane %v203_v11, %v213_v62  ;;  %v247_v22 = vsub.f32 %v239_v9, %v243_v13  ;;  %v202_v24 = vmul.f32 %v300_v15, %v190_v10 }
  0xc7   :  { %v302_v26 = vpop.eup %301  ;;  %v232_v27 = vmul.f32 %v218_v19, %v370_v16  ;;  %v236_v28 = vmul.f32 %v218_v19, %v381_v23  ;;  %v262_v29 = vrot.slane %v248_v20, %v213_v62  ;;  %v241_v23 = vld [vmem:[%s472_s2 + $0x2] sm:$0x1] }
  0xc8   :  { %v231_v30 = vmul.f32 %v214_v21, %v336_v2  ;;  %v235_v7 = vmul.f32 %v214_v21, %v345_v5  ;;  %v258_v31 = vrot.slane %v247_v22, %v213_v62  ;;  %v206_v32 = vadd.f32 1.0, %v202_v24 }
  0xc9   :  { %v276_v33 = vadd.f32 %v262_v29, %v232_v27  ;;  %v280_v34 = vadd.f32 %v262_v29, %v236_v28  ;;  %v246_v35 = vmul.f32 %v202_v24, %v170_v37  ;;  %v201_v36 = vmul.f32 %v302_v26, %v189_v25 }
  0xca   :  { %v275_v38 = vadd.f32 %v258_v31, %v231_v30  ;;  %v279_v39 = vadd.f32 %v258_v31, %v235_v7  ;;  %v226_v16 = vrot.slane %v206_v32, %v213_v62 }
  0xcb   :  { %284 = vst [vmem:[%s473_s3 + $0x4] sm:$0xf] %v276_v33  ;;  %288 = vst [vmem:[%s473_s3 + $0x14] sm:$0xf] %v280_v34  ;;  %v250_v2 = vsub.f32 %v242_v17, %v246_v35  ;;  %v205_v5 = vadd.f32 1.0, %v201_v36  ;;  %v245_v37 = vmul.f32 %v201_v36, %v409_v40 }
  0xcc   :  { %283 = vst [vmem:[%s473_s3] sm:$0xf] %v275_v38  ;;  %287 = vst [vmem:[%s473_s3 + $0x10] sm:$0xf] %v279_v39  ;;  %v234_v18 = vmul.f32 %v226_v16, %v358_v12  ;;  %v238_v41 = vmul.f32 %v226_v16, %v363_v14 }
  0xcd   :  { %v270_v42 = vrot.slane %v250_v2, %v213_v62  ;;  %v222_v43 = vrot.slane %v205_v5, %v213_v62  ;;  %v249_v44 = vsub.f32 %v241_v23, %v245_v37 }
  0xcf   :  { %v278_v45 = vadd.f32 %v270_v42, %v234_v18  ;;  %v282_v46 = vadd.f32 %v270_v42, %v238_v41  ;;  %v233_v47 = vmul.f32 %v222_v43, %v326_v0  ;;  %v237_v40 = vmul.f32 %v222_v43, %v331_v1 }
  0xd0   :  { %v266_v48 = vrot.slane %v249_v44, %v213_v62 }
  0xd1   :  { %286 = vst [vmem:[%s473_s3 + $0xc] sm:$0xf] %v278_v45  ;;  %290 = vst [vmem:[%s473_s3 + $0x1c] sm:$0xf] %v282_v46 }
  0xd2   :  { %v277_v12 = vadd.f32 %v266_v48, %v233_v47  ;;  %v281_v14 = vadd.f32 %v266_v48, %v237_v40 }
  0xd4   :  { %285 = vst [vmem:[%s473_s3 + $0x8] sm:$0xf] %v277_v12  ;;  %289 = vst [vmem:[%s473_s3 + $0x18] sm:$0xf] %v281_v14 }

</bundles_post_ra>
